<compile_context>
chip_gen: v7x
topology: tpu7x:2x2x1
jax: 0.10.0
libtpu: 0.0.40
codegen_flags: <defaults>
</compile_context>

<pallas_src>
import functools
import math

import jax
import jax.numpy as jnp
from jax.experimental import pallas as pl
from jax.experimental.pallas import tpu as pltpu


def _round_up(n, m):
    return ((n + m - 1) // m) * m


def _relukan_kernel(x_ref, ph_ref, w_ref, b_ref, o_ref, *, gk, in_pad,
                    fuse_slab, feat_dtype):
    """One batch tile of the ReLU-KAN layer.

    x_ref  : (TB, In_pad)   f32        input rows (zero-padded lanes)
    ph_ref : (2, K)         f32        [phase_low^T ; phase_height^T], K = gk*In_pad,
                                       flat index = j*In_pad + i
    w_ref  : (K, O_pad)     bf16/f32   conv weight (re-laid-out, r^2 folded in)
    b_ref  : (1, O_pad)     f32        conv bias (zero padded)
    o_ref  : (TB, O_pad)               output tile
    """
    x = x_ref[...].astype(feat_dtype)
    if fuse_slab:
        # Lane-aligned GK-way replication -> one fused MXU contraction.
        xt = jnp.concatenate([x] * gk, axis=-1)                   # (TB, K)
        plo = ph_ref[0:1, :].astype(feat_dtype)
        phi = ph_ref[1:2, :].astype(feat_dtype)
        x1 = jnp.maximum(xt - plo, 0.0)
        x2 = jnp.maximum(phi - xt, 0.0)
        f = x1 * x2
        f = (f * f).astype(w_ref.dtype)                           # r^2 folded in w
        acc = jnp.dot(f, w_ref[...], preferred_element_type=jnp.float32)
    else:
        # Large-In path: gk accumulated dots, no replicated slab.
        acc = jnp.zeros(o_ref.shape, jnp.float32)
        for j in range(gk):                     # gk is small -> static unroll
            lo = j * in_pad                     # 128-aligned static offsets
            plo = ph_ref[0:1, lo:lo + in_pad].astype(feat_dtype)
            phi = ph_ref[1:2, lo:lo + in_pad].astype(feat_dtype)
            x1 = jnp.maximum(x - plo, 0.0)
            x2 = jnp.maximum(phi - x, 0.0)
            f = x1 * x2
            f = (f * f).astype(w_ref.dtype)
            acc = acc + jnp.dot(f, w_ref[lo:lo + in_pad, :],
                                preferred_element_type=jnp.float32)
    o_ref[...] = (acc + b_ref[...]).astype(o_ref.dtype)


def relukan_forward(x, phase_low, phase_height, conv_w, conv_b, *, g, k,
                    input_size, output_size, block_b=256,
                    matmul_dtype=jnp.bfloat16, feature_dtype=jnp.float32,
                    out_dtype=jnp.float32, o_pad_multiple=128,
                    fuse_threshold=256):
    """x: (B, input_size, 1) -> (B, output_size, 1).

    feature_dtype=jnp.bfloat16 is recommended on v6e / v7x (bf16 VPU); keep
    jnp.float32 on v5e.  o_pad_multiple=256 can help on v6e / v7x when the
    kernel is MXU-bound.
    """
    B = x.shape[0]
    gk = g + k
    r = 4.0 * g * g / ((k + 1) * (k + 1))

    in_pad = _round_up(input_size, 128)        # lane-aligned replication segments
    K = gk * in_pad
    o_pad = _round_up(output_size, o_pad_multiple)
    fuse_slab = in_pad < fuse_threshold

    # --- batch tiling: multiple of 8 sublanes; give the pipeline (and megacore
    # chips) several batch tiles when there is enough real work.
    b8 = _round_up(max(B, 1), 8)
    min_tiles = 4 if b8 >= 32 else (2 if b8 >= 16 else 1)
    TB = min(block_b, _round_up(pl.cdiv(b8, min_tiles), 8))
    B_pad = _round_up(b8, TB)
    grid = (B_pad // TB,)

    # --- host-side operand prep -------------------------------------------
    x2d = x.reshape(B, input_size).astype(jnp.float32)
    x2d = jnp.pad(x2d, ((0, B_pad - B), (0, in_pad - input_size)))

    def _flat_phase(p):            # (In, gk) -> (1, K), flat index j*In_pad + i
        pt = jnp.zeros((gk, in_pad), jnp.float32)
        pt = pt.at[:, :input_size].set(jnp.transpose(p).astype(jnp.float32))
        return pt.reshape(1, K)

    phases = jnp.concatenate(
        [_flat_phase(phase_low), _flat_phase(phase_height)], axis=0)   # (2, K)

    # PyTorch's raw `f.reshape(B, 1, GK, In)` pairs feature f[b, i, j] with
    # conv_w.reshape(O, GK*In)[o, i*GK + j] == conv_w.reshape(O, In, GK)[o, i, j].
    w_ij = conv_w.reshape(output_size, input_size, gk).astype(jnp.float32)
    w_jio = jnp.transpose(w_ij, (2, 1, 0)) * (r * r)                   # fold r^2
    w_full = jnp.zeros((gk, in_pad, o_pad), jnp.float32)
    w_full = w_full.at[:, :input_size, :output_size].set(w_jio)
    w2d = w_full.reshape(K, o_pad).astype(matmul_dtype)

    b2d = jnp.zeros((1, o_pad), jnp.float32)
    b2d = b2d.at[0, :output_size].set(conv_b.astype(jnp.float32))

    # --- VMEM budget / cost hints -----------------------------------------
    feat_bytes = jnp.dtype(feature_dtype).itemsize
    mm_bytes = jnp.dtype(matmul_dtype).itemsize
    out_bytes = jnp.dtype(out_dtype).itemsize
    slab = K if fuse_slab else in_pad
    block_bytes = (2 * TB * in_pad * 4                       # x (double buffered)
                   + 2 * TB * o_pad * out_bytes               # out
                   + 2 * (K * o_pad * mm_bytes + 2 * K * 4 + o_pad * 4))
    temp_bytes = TB * slab * (4 * feat_bytes + mm_bytes) + TB * o_pad * 4
    vmem_limit = int(min(64 * 2**20,
                         max(32 * 2**20, (block_bytes + temp_bytes) * 3 // 2)))

    flops = int(2 * B_pad * K * o_pad + 6 * B_pad * K)
    bytes_accessed = int(x2d.size * 4 + phases.size * 4 + w2d.size * mm_bytes
                         + b2d.size * 4 + B_pad * o_pad * out_bytes)

    kernel = functools.partial(_relukan_kernel, gk=gk, in_pad=in_pad,
                               fuse_slab=fuse_slab, feat_dtype=feature_dtype)

    def _run(single_buffer_resident):
        res_kw = {}
        if single_buffer_resident and hasattr(pl, "Buffered"):
            # Grid-invariant operands: one buffer is enough (index_map is constant).
            res_kw = dict(pipeline_mode=pl.Buffered(1))
        call = pl.pallas_call(
            kernel,
            out_shape=jax.ShapeDtypeStruct((B_pad, o_pad), out_dtype),
            grid=grid,
            in_specs=[
                pl.BlockSpec((TB, in_pad), lambda b: (b, 0)),           # x (batch tiled)
                pl.BlockSpec((2, K), lambda b: (0, 0), **res_kw),       # phases (resident)
                pl.BlockSpec((K, o_pad), lambda b: (0, 0), **res_kw),   # weight (resident)
                pl.BlockSpec((1, o_pad), lambda b: (0, 0), **res_kw),   # bias (resident)
            ],
            out_specs=pl.BlockSpec((TB, o_pad), lambda b: (b, 0)),
            compiler_params=pltpu.CompilerParams(
                dimension_semantics=("parallel",),
                vmem_limit_bytes=vmem_limit),
            cost_estimate=pl.CostEstimate(
                flops=flops, transcendentals=0, bytes_accessed=bytes_accessed),
        )
        return jax.block_until_ready(call(x2d, phases, w2d, b2d))

    try:
        out = _run(True)
    except Exception:
        # Fallback if single-buffered resident operands are not supported.
        out = _run(False)

    return out[:B, :output_size].reshape(B, output_size, 1)


def relukan_reference(x, phase_low, phase_height, conv_w, conv_b, *, g, k,
                      input_size, output_size):
    """Pure-JAX replica of the PyTorch forward (for verification)."""
    r = 4.0 * g * g / ((k + 1) * (k + 1))
    B = x.shape[0]
    x1 = jnp.maximum(x - phase_low, 0.0)            # (B, In, GK) via broadcast
    x2 = jnp.maximum(phase_height - x, 0.0)
    f = x1 * x2 * r
    f = f * f
    f = f.reshape(B, 1, g + k, input_size)          # raw reshape, like PyTorch
    out = jnp.einsum('bchw,ochw->bo', f, conv_w,
                     precision=jax.lax.Precision.HIGHEST) + conv_b
    return out.reshape(B, output_size, 1)


if __name__ == "__main__":
    key = jax.random.PRNGKey(0)

    configs = [
        # name, batch, In, g, k, O, matmul_dtype, feature_dtype, atol, rtol
        ("slab_f32",  2, 16, 4, 3, 8, jnp.float32,  jnp.float32,  5e-3, 5e-3),
        ("slab_bf16", 2, 16, 4, 3, 8, jnp.bfloat16, jnp.bfloat16, 1.5e-1, 5e-2),
        ("perj_f32",  40, 200, 5, 3, 24, jnp.float32,  jnp.float32,  5e-3, 5e-3),
        ("perj_bf16", 40, 200, 5, 3, 24, jnp.bfloat16, jnp.bfloat16, 1.5e-1, 5e-2),
    ]

    for (name, batch, input_size, g, k, output_size,
         mm_dt, ft_dt, atol, rtol) in configs:
        gk = g + k
        key, kx, kw, kb = jax.random.split(key, 4)

        # Deterministic parameters matching the module's __init__ shapes.
        phase_low_row = jnp.arange(-k, g, dtype=jnp.float32) / g          # (GK,)
        phase_low = jnp.tile(phase_low_row[None, :], (input_size, 1))     # (In, GK)
        phase_height = phase_low + (k + 1) / g                            # (In, GK)

        fan_in = 1 * gk * input_size
        bound = math.sqrt(1.0 / fan_in)
        conv_w = jax.random.uniform(kw, (output_size, 1, gk, input_size),
                                    jnp.float32, -bound, bound)
        conv_b = jax.random.uniform(kb, (output_size,), jnp.float32,
                                    -bound, bound)

        # Input: (batch, input_size, 1), like the PyTorch module expects.
        xin = jax.random.uniform(kx, (batch, input_size, 1), jnp.float32,
                                 0.0, 1.0)

        ref = relukan_reference(xin, phase_low, phase_height, conv_w, conv_b,
                                g=g, k=k, input_size=input_size,
                                output_size=output_size)
        out = relukan_forward(xin, phase_low, phase_height, conv_w, conv_b,
                              g=g, k=k, input_size=input_size,
                              output_size=output_size,
                              matmul_dtype=mm_dt, feature_dtype=ft_dt)
        out = jax.block_until_ready(out)
        assert out.shape == (batch, output_size, 1), (name, out.shape)
        out32 = out.astype(jnp.float32)
        err = float(jnp.max(jnp.abs(out32 - ref)))
        assert jnp.allclose(out32, ref, atol=atol, rtol=rtol), \
            f"{name}: max abs err = {err}"

    print("KERNEL_OK")
</pallas_src>

<mosaic_0001>
module attributes {stable_mosaic.version = 11 : i64} {
  func.func @_relukan_kernel(%arg0: i32, %arg1: memref<8x128xf32, #tpu.memory_space<vmem>>, %arg2: memref<2x896xf32, #tpu.memory_space<vmem>>, %arg3: memref<896x128xf32, #tpu.memory_space<vmem>>, %arg4: memref<1x128xf32, #tpu.memory_space<vmem>>, %arg5: memref<8x128xf32, #tpu.memory_space<vmem>>) attributes {dimension_semantics = [#tpu.dimension_semantics<parallel>], iteration_bounds = array<i64: 1>, scalar_prefetch = 0 : i64, scratch_operands = 0 : i64, tpu.core_type = #tpu.core_type<tc>, window_params = [{transform_indices = @transform_0, window_bounds = array<i64: 8, 128>}, {pipeline_mode = #tpu.pipeline_mode<synchronous>, transform_indices = @transform_1, window_bounds = array<i64: 2, 896>}, {pipeline_mode = #tpu.pipeline_mode<synchronous>, transform_indices = @transform_2, window_bounds = array<i64: 896, 128>}, {pipeline_mode = #tpu.pipeline_mode<synchronous>, transform_indices = @transform_3, window_bounds = array<i64: 1, 128>}, {transform_indices = @transform_4, window_bounds = array<i64: 8, 128>}]} {
    %c0 = arith.constant 0 : index
    %c0_0 = arith.constant 0 : index
    %0 = vector.load %arg1[%c0, %c0_0] : memref<8x128xf32, #tpu.memory_space<vmem>>, vector<8x128xf32>
    %1 = tpu.concatenate %0, %0, %0, %0, %0, %0, %0 in 1 : vector<8x128xf32>, vector<8x128xf32>, vector<8x128xf32>, vector<8x128xf32>, vector<8x128xf32>, vector<8x128xf32>, vector<8x128xf32> -> vector<8x896xf32>
    %c0_1 = arith.constant 0 : index
    %c0_2 = arith.constant 0 : index
    %2 = vector.load %arg2[%c0_1, %c0_2] : memref<2x896xf32, #tpu.memory_space<vmem>>, vector<1x896xf32>
    %c1 = arith.constant 1 : index
    %c0_3 = arith.constant 0 : index
    %3 = vector.load %arg2[%c1, %c0_3] : memref<2x896xf32, #tpu.memory_space<vmem>>, vector<1x896xf32>
    %4 = vector.broadcast %2 : vector<1x896xf32> to vector<8x896xf32>
    %5 = arith.subf %1, %4 : vector<8x896xf32>
    %cst = arith.constant 0.000000e+00 : f32
    %6 = vector.broadcast %cst : f32 to vector<8x896xf32>
    %7 = arith.maximumf %5, %6 : vector<8x896xf32>
    %8 = vector.broadcast %3 : vector<1x896xf32> to vector<8x896xf32>
    %9 = arith.subf %8, %1 : vector<8x896xf32>
    %cst_4 = arith.constant 0.000000e+00 : f32
    %10 = vector.broadcast %cst_4 : f32 to vector<8x896xf32>
    %11 = arith.maximumf %9, %10 : vector<8x896xf32>
    %12 = arith.mulf %7, %11 : vector<8x896xf32>
    %13 = arith.mulf %12, %12 : vector<8x896xf32>
    %c0_5 = arith.constant 0 : index
    %c0_6 = arith.constant 0 : index
    %14 = vector.load %arg3[%c0_5, %c0_6] : memref<896x128xf32, #tpu.memory_space<vmem>>, vector<896x128xf32>
    %cst_7 = arith.constant dense<0.000000e+00> : vector<8x128xf32>
    %15 = tpu.matmul %13, %14, %cst_7 {dimension_numbers = #tpu.dot_dimension_numbers<[1], [0], [0], [1], [0, 0, 1, 1], [], []>} : vector<8x896xf32>, vector<896x128xf32>, vector<8x128xf32> -> vector<8x128xf32>
    %c0_8 = arith.constant 0 : index
    %c0_9 = arith.constant 0 : index
    %16 = vector.load %arg4[%c0_8, %c0_9] : memref<1x128xf32, #tpu.memory_space<vmem>>, vector<1x128xf32>
    %17 = vector.broadcast %16 : vector<1x128xf32> to vector<8x128xf32>
    %18 = arith.addf %15, %17 : vector<8x128xf32>
    %c0_10 = arith.constant 0 : index
    %c0_11 = arith.constant 0 : index
    %19 = vector.load %arg5[%c0_10, %c0_11] : memref<8x128xf32, #tpu.memory_space<vmem>>, vector<8x128xf32>
    tpu.vector_store %arg5[%c0_10, %c0_11], %18 {strides = array<i32>} : memref<8x128xf32, #tpu.memory_space<vmem>>, vector<8x128xf32>,
    return
  }
  func.func @transform_0(%arg0: i32) -> (i32, i32) {
    %c0_i32 = arith.constant 0 : i32
    %c0_i32_0 = arith.constant 0 : i32
    return %arg0, %c0_i32 : i32, i32
  }
  func.func @transform_1(%arg0: i32) -> (i32, i32) {
    %c0_i32 = arith.constant 0 : i32
    %c0_i32_0 = arith.constant 0 : i32
    %c0_i32_1 = arith.constant 0 : i32
    return %c0_i32, %c0_i32_0 : i32, i32
  }
  func.func @transform_2(%arg0: i32) -> (i32, i32) {
    %c0_i32 = arith.constant 0 : i32
    %c0_i32_0 = arith.constant 0 : i32
    %c0_i32_1 = arith.constant 0 : i32
    return %c0_i32, %c0_i32_0 : i32, i32
  }
  func.func @transform_3(%arg0: i32) -> (i32, i32) {
    %c0_i32 = arith.constant 0 : i32
    %c0_i32_0 = arith.constant 0 : i32
    %c0_i32_1 = arith.constant 0 : i32
    return %c0_i32, %c0_i32_0 : i32, i32
  }
  func.func @transform_4(%arg0: i32) -> (i32, i32) {
    %c0_i32 = arith.constant 0 : i32
    %c0_i32_0 = arith.constant 0 : i32
    return %arg0, %c0_i32 : i32, i32
  }
}

module attributes {stable_mosaic.version = 11 : i64} {
  func.func @_relukan_kernel(%arg0: i32, %arg1: memref<8x128xf32, #tpu.memory_space<vmem>>, %arg2: memref<2x896xf32, #tpu.memory_space<vmem>>, %arg3: memref<896x128xf32, #tpu.memory_space<vmem>>, %arg4: memref<1x128xf32, #tpu.memory_space<vmem>>, %arg5: memref<8x128xf32, #tpu.memory_space<vmem>>) attributes {dimension_semantics = [#tpu.dimension_semantics<parallel>], iteration_bounds = array<i64: 1>, scalar_prefetch = 0 : i64, scratch_operands = 0 : i64, tpu.core_type = #tpu.core_type<tc>, window_params = [{transform_indices = @transform_0, window_bounds = array<i64: 8, 128>}, {pipeline_mode = #tpu.pipeline_mode<synchronous>, transform_indices = @transform_1, window_bounds = array<i64: 2, 896>}, {pipeline_mode = #tpu.pipeline_mode<synchronous>, transform_indices = @transform_2, window_bounds = array<i64: 896, 128>}, {pipeline_mode = #tpu.pipeline_mode<synchronous>, transform_indices = @transform_3, window_bounds = array<i64: 1, 128>}, {transform_indices = @transform_4, window_bounds = array<i64: 8, 128>}]} {
    %c0 = arith.constant 0 : index
    %c0_0 = arith.constant 0 : index
    %0 = vector.load %arg1[%c0, %c0_0] : memref<8x128xf32, #tpu.memory_space<vmem>>, vector<8x128xf32>
    %1 = tpu.concatenate %0, %0, %0, %0, %0, %0, %0 in 1 : vector<8x128xf32>, vector<8x128xf32>, vector<8x128xf32>, vector<8x128xf32>, vector<8x128xf32>, vector<8x128xf32>, vector<8x128xf32> -> vector<8x896xf32>
    %c0_1 = arith.constant 0 : index
    %c0_2 = arith.constant 0 : index
    %2 = vector.load %arg2[%c0_1, %c0_2] : memref<2x896xf32, #tpu.memory_space<vmem>>, vector<1x896xf32>
    %c1 = arith.constant 1 : index
    %c0_3 = arith.constant 0 : index
    %3 = vector.load %arg2[%c1, %c0_3] : memref<2x896xf32, #tpu.memory_space<vmem>>, vector<1x896xf32>
    %4 = vector.broadcast %2 : vector<1x896xf32> to vector<8x896xf32>
    %5 = arith.subf %1, %4 : vector<8x896xf32>
    %cst = arith.constant 0.000000e+00 : f32
    %6 = vector.broadcast %cst : f32 to vector<8x896xf32>
    %7 = arith.maximumf %5, %6 : vector<8x896xf32>
    %8 = vector.broadcast %3 : vector<1x896xf32> to vector<8x896xf32>
    %9 = arith.subf %8, %1 : vector<8x896xf32>
    %cst_4 = arith.constant 0.000000e+00 : f32
    %10 = vector.broadcast %cst_4 : f32 to vector<8x896xf32>
    %11 = arith.maximumf %9, %10 : vector<8x896xf32>
    %12 = arith.mulf %7, %11 : vector<8x896xf32>
    %13 = arith.mulf %12, %12 : vector<8x896xf32>
    %c0_5 = arith.constant 0 : index
    %c0_6 = arith.constant 0 : index
    %14 = vector.load %arg3[%c0_5, %c0_6] : memref<896x128xf32, #tpu.memory_space<vmem>>, vector<896x128xf32>
    %cst_7 = arith.constant dense<0.000000e+00> : vector<8x128xf32>
    %15 = tpu.matmul %13, %14, %cst_7 {dimension_numbers = #tpu.dot_dimension_numbers<[1], [0], [0], [1], [0, 0, 1, 1], [], []>} : vector<8x896xf32>, vector<896x128xf32>, vector<8x128xf32> -> vector<8x128xf32>
    %c0_8 = arith.constant 0 : index
    %c0_9 = arith.constant 0 : index
    %16 = vector.load %arg4[%c0_8, %c0_9] : memref<1x128xf32, #tpu.memory_space<vmem>>, vector<1x128xf32>
    %17 = vector.broadcast %16 : vector<1x128xf32> to vector<8x128xf32>
    %18 = arith.addf %15, %17 : vector<8x128xf32>
    %c0_10 = arith.constant 0 : index
    %c0_11 = arith.constant 0 : index
    %19 = vector.load %arg5[%c0_10, %c0_11] : memref<8x128xf32, #tpu.memory_space<vmem>>, vector<8x128xf32>
    tpu.vector_store %arg5[%c0_10, %c0_11], %18 {strides = array<i32>} : memref<8x128xf32, #tpu.memory_space<vmem>>, vector<8x128xf32>,
    return
  }
  func.func @transform_0(%arg0: i32) -> (i32, i32) {
    %c0_i32 = arith.constant 0 : i32
    %c0_i32_0 = arith.constant 0 : i32
    return %arg0, %c0_i32 : i32, i32
  }
  func.func @transform_1(%arg0: i32) -> (i32, i32) {
    %c0_i32 = arith.constant 0 : i32
    %c0_i32_0 = arith.constant 0 : i32
    %c0_i32_1 = arith.constant 0 : i32
    return %c0_i32, %c0_i32_0 : i32, i32
  }
  func.func @transform_2(%arg0: i32) -> (i32, i32) {
    %c0_i32 = arith.constant 0 : i32
    %c0_i32_0 = arith.constant 0 : i32
    %c0_i32_1 = arith.constant 0 : i32
    return %c0_i32, %c0_i32_0 : i32, i32
  }
  func.func @transform_3(%arg0: i32) -> (i32, i32) {
    %c0_i32 = arith.constant 0 : i32
    %c0_i32_0 = arith.constant 0 : i32
    %c0_i32_1 = arith.constant 0 : i32
    return %c0_i32, %c0_i32_0 : i32, i32
  }
  func.func @transform_4(%arg0: i32) -> (i32, i32) {
    %c0_i32 = arith.constant 0 : i32
    %c0_i32_0 = arith.constant 0 : i32
    return %arg0, %c0_i32 : i32, i32
  }
}

</mosaic_0001>

<bundles_post_ra>
// kernel: tpu_custom_call.1
= control target key start
LH: loop header
LB: loop body
LE: loop exit
PB: predicated region body
PF: predicated region fallthrough
CT: control target
= control target key end

     0   :  { %9 = vsyncpa [#allocation3], 0  ;;  %s1112_s0 = inlined_call_operand.hbm [shape: f32[8,128], index: 0, kind: input, shape index: {}]   ;;  %s1113_s1 = inlined_call_operand.hbm [shape: f32[2,896], index: 1, kind: input, shape index: {}]   ;;  %s1114_s2 = inlined_call_operand.hbm [shape: f32[896,128], index: 2, kind: input, shape index: {}]   ;;  %s1115_s3 = inlined_call_operand.vmem [shape: f32[1,128], index: 3, kind: input, shape index: {}]   ;;  %s1116_s4 = inlined_call_operand.hbm [shape: f32[8,128], index: 4, kind: output, shape index: {}]  }
   0x1   :  { %10 = vsyncpa [#allocation6], 0 }
   0x2   :  { %11 = vsyncpa [#allocation4], 0  ;;  %s970_s15 = smov [#allocation5]   ;;  %s971_s17 = smov [#allocation2]  }
   0x3   :  { %s28_s16 = sshll.u32 %s970_s15, 4  ;;  %s18_s18 = sshll.u32 %s971_s17, 4  ;;  %s29_s16 = int_to_ptr.vmem [resolvable:$true] %s28_s16  ;;  %s19_s18 = int_to_ptr.vmem [resolvable:$true] %s18_s18 }
   0x4   :  { %s876_s21 = scalar_lea.hbm %s1113_s1, 224 }
   0x5   :  { %p877_p0 = scmp.ne.s32.totalorder %s1113_s1, %s876_s21  ;;  %p880_p1 = scmp.lt.u32.totalorder %s876_s21, %s1113_s1 }
   0x7   :  { %p882_p2 = pnand %p880_p1, %p877_p0 }
   0x9   :  { %885 = shalt.err (!%p882_p2)
}
   0xa   :  { %s886_s26 = scalar_lea.vmem %s29_s16, 224  ;;  %p891_p4 = scmp.lt.s32.totalorder %s29_s16, %s29_s16 }
   0xb   :  { %p887_p3 = scmp.ne.s32.totalorder %s29_s16, %s886_s26  ;;  %p892_p5 = scmp.lt.s32.totalorder %s886_s26, %s886_s26 }
   0xd   :  { %p893_p6 = por %p892_p5, %p891_p4 }
   0xf   :  { %p894_p7 = pnand %p893_p6, %p887_p3 }
  0x11   :  { %897 = shalt.err (!%p894_p7)
}
  0x12   :  { %31 = dma.hbm_to_vmem [thread:$0]  %s1113_s1, 224, %s29_s16, [#allocation6]  }
  0x13   :  { %s898_s5 = scalar_lea.hbm %s1112_s0, 128 }
  0x14   :  { %p899_p8 = scmp.ne.s32.totalorder %s1112_s0, %s898_s5  ;;  %p902_p9 = scmp.lt.u32.totalorder %s898_s5, %s1112_s0 }
  0x16   :  { %p904_p10 = pnand %p902_p9, %p899_p8 }
  0x18   :  { %907 = shalt.err (!%p904_p10)
}
  0x19   :  { %s908_s10 = scalar_lea.vmem %s19_s18, 128  ;;  %p913_p12 = scmp.lt.s32.totalorder %s19_s18, %s19_s18 }
  0x1a   :  { %p909_p11 = scmp.ne.s32.totalorder %s19_s18, %s908_s10  ;;  %p914_p13 = scmp.lt.s32.totalorder %s908_s10, %s908_s10 }
  0x1c   :  { %p915_p0 = por %p914_p13, %p913_p12 }
  0x1e   :  { %p916_p1 = pnand %p915_p0, %p909_p11 }
  0x20   :  { %919 = shalt.err (!%p916_p1)
}
  0x21   :  { %21 = dma.hbm_to_vmem [thread:$0]  %s1112_s0, 128, %s19_s18, [#allocation3]  }
  0x22   :  { %s972_s12 = smov [#allocation7]   ;;  %s920_s16 = scalar_lea.hbm %s1114_s2, 14336 }
  0x23   :  { %s37_s13 = sshll.u32 %s972_s12, 4  ;;  %p921_p2 = scmp.ne.s32.totalorder %s1114_s2, %s920_s16  ;;  %s38_s13 = int_to_ptr.vmem [resolvable:$true] %s37_s13 }
  0x24   :  { %p924_p3 = scmp.lt.u32.totalorder %s920_s16, %s1114_s2 }
  0x26   :  { %p926_p4 = pnand %p924_p3, %p921_p2 }
  0x28   :  { %929 = shalt.err (!%p926_p4)
}
  0x29   :  { %s930_s22 = scalar_lea.vmem %s38_s13, 14336  ;;  %p935_p6 = scmp.lt.s32.totalorder %s38_s13, %s38_s13 }
  0x2a   :  { %p931_p5 = scmp.ne.s32.totalorder %s38_s13, %s930_s22  ;;  %p936_p7 = scmp.lt.s32.totalorder %s930_s22, %s930_s22 }
  0x2c   :  { %p937_p8 = por %p936_p7, %p935_p6 }
  0x2e   :  { %p938_p9 = pnand %p937_p8, %p931_p5 }
  0x30   :  { %941 = shalt.err (!%p938_p9)
}
  0x31   :  { %s973_s0 = smov 128   ;;  %s974_s18 = smov 8  }
  0x32   :  { %43 = dma.hbm_to_vmem [thread:$0]  %s1114_s2, 14336, %s38_s13, [#allocation6], %s973_s0, %s973_s0, %s974_s18  }
  0x33   :  { %964 = dma.done.wait [#allocation3], 128  }
  0x34   :  { %965 = vsyncadd [#allocation3], 4294967168 }
  0x35   :  { %966 = dma.done.wait [#allocation6], 14560  }
  0x36   :  { %967 = vsyncadd [#allocation6], 4294952736  ;;  %v189_v0 = vld [vmem:[#allocation7 + $0x80] sm:$0xff]  ;;  %v190_v1 = vld [vmem:[#allocation7 + $0x88] sm:$0xff]  ;;  %v60_v47 = vlaneseq  ;;  %vm976_vm0 = vmmov 0   ;;  %s978_s26 = smov [#allocation8]  }
  0x37   :  { %v173_v2 = vld [vmem:[#allocation7] sm:$0xff]  ;;  %v747_v3 = vpack.c.bf16 %v190_v1, %v189_v0  ;;  %v174_v4 = vld [vmem:[#allocation7 + $0x8] sm:$0xff]  ;;  %v191_v11 = vld [vmem:[#allocation7 + $0x90] sm:$0xff]  ;;  %s579_s27 = sshll.u32 %s978_s26, 4  ;;  %s580_s27 = int_to_ptr.vmem [resolvable:$true] %s579_s27 }
  0x38   :  { %v221_v5 = vld [vmem:[#allocation7 + $0x180] sm:$0xff]  ;;  %v222_v6 = vld [vmem:[#allocation7 + $0x188] sm:$0xff]  ;;  %v749_v7 = vpack.c.bf16 %v174_v4, %v173_v2  ;;  %v192_v13 = vld [vmem:[#allocation7 + $0x98] sm:$0xff]  ;;  %v1040_v61 = vshrl.u32 %v60_v47, 7  ;;  %s942_s28 = scalar_lea.vmem %s580_s27, 128  ;;  %p947_p11 = scmp.lt.s32.totalorder %s580_s27, %s580_s27 }
  0x39   :  { %v779_v8 = vpack.c.bf16 %v222_v6, %v221_v5  ;;  %v205_v9 = vld [vmem:[#allocation7 + $0x100] sm:$0xff]  ;;  %v206_v10 = vld [vmem:[#allocation7 + $0x108] sm:$0xff]  ;;  %748 = vmatprep.subr.bf16.mxu0 %v747_v3  ;;  %v175_v14 = vld [vmem:[#allocation7 + $0x10] sm:$0xff]  ;;  %v751_v16 = vpack.c.bf16 %v192_v13, %v191_v11  ;;  %p943_p10 = scmp.ne.s32.totalorder %s580_s27, %s942_s28  ;;  %p948_p12 = scmp.lt.s32.totalorder %s942_s28, %s942_s28 }
  0x3a   :  { %v781_v12 = vpack.c.bf16 %v206_v10, %v205_v9  ;;  %v176_v15 = vld [vmem:[#allocation7 + $0x18] sm:$0xff]  ;;  %750 = vmatpush3.bf16.msra.mxu0 %v749_v7  ;;  %v223_v18 = vld [vmem:[#allocation7 + $0x190] sm:$0xff]  ;;  %v193_v23 = vld [vmem:[#allocation7 + $0xa0] sm:$0xff] }
  0x3b   :  { %780 = vmatprep.subr.bf16.mxu1 %v779_v8  ;;  %v753_v17 = vpack.c.bf16 %v176_v15, %v175_v14  ;;  %v224_v19 = vld [vmem:[#allocation7 + $0x198] sm:$0xff]  ;;  %v207_v20 = vld [vmem:[#allocation7 + $0x110] sm:$0xff]  ;;  %v194_v24 = vld [vmem:[#allocation7 + $0xa8] sm:$0xff]  ;;  %752 = vmatprep.subr.bf16.mxu0 %v751_v16  ;;  %v66_v16 = vsub.s32 1, %v1040_v61  ;;  %p949_p13 = por %p948_p12, %p947_p11 }
  0x3c   :  { %782 = vmatpush3.bf16.msra.mxu1 %v781_v12  ;;  %v783_v21 = vpack.c.bf16 %v224_v19, %v223_v18  ;;  %v208_v22 = vld [vmem:[#allocation7 + $0x118] sm:$0xff]  ;;  %v755_v26 = vpack.c.bf16 %v194_v24, %v193_v23  ;;  %v177_v27 = vld [vmem:[#allocation7 + $0x20] sm:$0xff]  ;;  %v178_v28 = vld [vmem:[#allocation7 + $0x28] sm:$0xff]  ;;  %v74_v19 = vsub.s32 3, %v1040_v61 }
  0x3d   :  { %v785_v25 = vpack.c.bf16 %v208_v22, %v207_v20  ;;  %v225_v29 = vld [vmem:[#allocation7 + $0x1a0] sm:$0xff]  ;;  %v226_v30 = vld [vmem:[#allocation7 + $0x1a8] sm:$0xff]  ;;  %v757_v33 = vpack.c.bf16 %v178_v28, %v177_v27  ;;  %v195_v35 = vld [vmem:[#allocation7 + $0xb0] sm:$0xff]  ;;  %p950_p0 = pnand %p949_p13, %p943_p10 }
  0x3e   :  { %784 = vmatprep.subr.bf16.mxu1 %v783_v21  ;;  %v209_v31 = vld [vmem:[#allocation7 + $0x120] sm:$0xff]  ;;  %v210_v32 = vld [vmem:[#allocation7 + $0x128] sm:$0xff]  ;;  %754 = vmatpush3.bf16.msra.mxu0 %v753_v17  ;;  %v787_v34 = vpack.c.bf16 %v226_v30, %v225_v29  ;;  %v196_v36 = vld [vmem:[#allocation7 + $0xb8] sm:$0xff]  ;;  %v62_v17 = vsub.s32 0, %v1040_v61 }
  0x3f   :  { %v179_v37 = vld [vmem:[#allocation7 + $0x30] sm:$0xff]  ;;  %756 = vmatprep.subr.bf16.mxu0 %v755_v26  ;;  %v789_v38 = vpack.c.bf16 %v210_v32, %v209_v31  ;;  %v759_v39 = vpack.c.bf16 %v196_v36, %v195_v35  ;;  %v180_v40 = vld [vmem:[#allocation7 + $0x38] sm:$0xff]  ;;  %v197_v46 = vld [vmem:[#allocation7 + $0xc0] sm:$0xff]  ;;  %v70_v32 = vsub.s32 2, %v1040_v61 }
  0x40   :  { %786 = vmatpush3.bf16.msra.mxu1 %v785_v25  ;;  %v227_v41 = vld [vmem:[#allocation7 + $0x1b0] sm:$0xff]  ;;  %v228_v42 = vld [vmem:[#allocation7 + $0x1b8] sm:$0xff]  ;;  %v198_v48 = vld [vmem:[#allocation7 + $0xc8] sm:$0xff]  ;;  %v761_v49 = vpack.c.bf16 %v180_v40, %v179_v37 }
  0x41   :  { %788 = vmatprep.subr.bf16.mxu1 %v787_v34  ;;  %v791_v43 = vpack.c.bf16 %v228_v42, %v227_v41  ;;  %v211_v44 = vld [vmem:[#allocation7 + $0x130] sm:$0xff]  ;;  %v212_v45 = vld [vmem:[#allocation7 + $0x138] sm:$0xff]  ;;  %v229_v50 = vld [vmem:[#allocation7 + $0x1c0] sm:$0xff]  ;;  %v763_v53 = vpack.c.bf16 %v198_v48, %v197_v46 }
  0x42   :  { %758 = vmatpush3.bf16.msra.mxu0 %v757_v33  ;;  %v230_v51 = vld [vmem:[#allocation7 + $0x1c8] sm:$0xff]  ;;  %v793_v52 = vpack.c.bf16 %v212_v45, %v211_v44  ;;  %v181_v54 = vld [vmem:[#allocation7 + $0x40] sm:$0xff]  ;;  %v199_v59 = vld [vmem:[#allocation7 + $0xd0] sm:$0xff] }
  0x43   :  { %760 = vmatprep.subr.bf16.mxu0 %v759_v39  ;;  %v182_v55 = vld [vmem:[#allocation7 + $0x48] sm:$0xff]  ;;  %v213_v56 = vld [vmem:[#allocation7 + $0x140] sm:$0xff]  ;;  %v795_v57 = vpack.c.bf16 %v230_v51, %v229_v50  ;;  %v200_v60 = vld [vmem:[#allocation7 + $0xd8] sm:$0xff] }
  0x44   :  { %790 = vmatpush3.bf16.msra.mxu1 %v789_v38  ;;  %v214_v58 = vld [vmem:[#allocation7 + $0x148] sm:$0xff]  ;;  %v183_v62 = vld [vmem:[#allocation7 + $0x50] sm:$0xff]  ;;  %v184_v63 = vld [vmem:[#allocation7 + $0x58] sm:$0xff]  ;;  %v765_v3 = vpack.c.bf16 %v182_v55, %v181_v54  ;;  %v767_v8 = vpack.c.bf16 %v200_v60, %v199_v59 }
  0x45   :  { %792 = vmatprep.subr.bf16.mxu1 %v791_v43  ;;  %v231_v0 = vld [vmem:[#allocation7 + $0x1d0] sm:$0xff]  ;;  %v232_v1 = vld [vmem:[#allocation7 + $0x1d8] sm:$0xff]  ;;  %v201_v5 = vld [vmem:[#allocation7 + $0xe0] sm:$0xff]  ;;  %v797_v7 = vpack.c.bf16 %v214_v58, %v213_v56  ;;  %v769_v20 = vpack.c.bf16 %v184_v63, %v183_v62 }
  0x46   :  { %v215_v2 = vld [vmem:[#allocation7 + $0x150] sm:$0xff]  ;;  %762 = vmatpush3.bf16.msra.mxu0 %v761_v49  ;;  %v216_v4 = vld [vmem:[#allocation7 + $0x158] sm:$0xff]  ;;  %v202_v6 = vld [vmem:[#allocation7 + $0xe8] sm:$0xff]  ;;  %v799_v12 = vpack.c.bf16 %v232_v1, %v231_v0 }
  0x47   :  { %764 = vmatprep.subr.bf16.mxu0 %v763_v53  ;;  %v185_v9 = vld [vmem:[#allocation7 + $0x60] sm:$0xff]  ;;  %v186_v10 = vld [vmem:[#allocation7 + $0x68] sm:$0xff]  ;;  %v203_v18 = vld [vmem:[#allocation7 + $0xf0] sm:$0xff]  ;;  %v801_v21 = vpack.c.bf16 %v216_v4, %v215_v2  ;;  %v771_v22 = vpack.c.bf16 %v202_v6, %v201_v5 }
  0x48   :  { %794 = vmatpush3.bf16.msra.mxu1 %v793_v52  ;;  %v233_v11 = vld [vmem:[#allocation7 + $0x1e0] sm:$0xff]  ;;  %v234_v13 = vld [vmem:[#allocation7 + $0x1e8] sm:$0xff]  ;;  %v204_v23 = vld [vmem:[#allocation7 + $0xf8] sm:$0xff]  ;;  %v773_v26 = vpack.c.bf16 %v186_v10, %v185_v9 }
  0x49   :  { %796 = vmatprep.subr.bf16.mxu1 %v795_v57  ;;  %v217_v14 = vld [vmem:[#allocation7 + $0x160] sm:$0xff]  ;;  %v218_v15 = vld [vmem:[#allocation7 + $0x168] sm:$0xff]  ;;  %v1045_v24 = vld [vmem:[#allocation7 + $0x70] sm:$0xff]  ;;  %v803_v27 = vpack.c.bf16 %v234_v13, %v233_v11  ;;  %v775_v39 = vpack.c.bf16 %v204_v23, %v203_v18  ;;  %v82_v18 = vsub.s32 5, %v1040_v61  ;;  %v975_v23 = vmov 0.0|0.0  }
  0x4a   :  { %766 = vmatpush3.bf16.msra.mxu0 %v765_v3  ;;  %v1047_v25 = vld [vmem:[#allocation7 + $0x78] sm:$0xff]  ;;  %v805_v28 = vpack.c.bf16 %v218_v15, %v217_v14  ;;  %v1049_v29 = vld [vmem:[#allocation2] sm:$0xff]  ;;  %v253_v50 = vld [vmem:[#allocation7 + $0x280] sm:$0xff] }
  0x4b   :  { %768 = vmatprep.subr.bf16.mxu0 %v767_v8  ;;  %v1051_v30 = vld [vmem:[#allocation5] ss:$2 sm:$0xff]  ;;  %v1053_v31 = vld [vmem:[#allocation5 + $0x1] ss:$2 sm:$0xff]  ;;  %v777_v40 = vpack.c.bf16 %v1047_v25, %v1045_v24  ;;  %v254_v51 = vld [vmem:[#allocation7 + $0x288] sm:$0xff] }
  0x4c   :  { %798 = vmatpush3.bf16.msra.mxu1 %v797_v7  ;;  %v235_v33 = vld [vmem:[#allocation7 + $0x1f0] sm:$0xff]  ;;  %v236_v34 = vld [vmem:[#allocation7 + $0x1f8] sm:$0xff]  ;;  %v67_v35 = vrot.slane %v1051_v30, %v66_v16  ;;  %v117_v36 = vrot.slane %v1053_v31, %v66_v16  ;;  %v63_v37 = vrot.slane %v1051_v30, %v62_v17  ;;  %v113_v38 = vrot.slane %v1053_v31, %v62_v17  ;;  %v237_v4 = vld [vmem:[#allocation7 + $0x200] sm:$0xff] }
  0x4d   :  { %800 = vmatprep.subr.bf16.mxu1 %v799_v12  ;;  %v75_v41 = vrot.slane %v1051_v30, %v74_v19  ;;  %v125_v42 = vrot.slane %v1053_v31, %v74_v19  ;;  %v219_v45 = vld [vmem:[#allocation7 + $0x170] sm:$0xff]  ;;  %v807_v48 = vpack.c.bf16 %v236_v34, %v235_v33  ;;  %v220_v49 = vld [vmem:[#allocation7 + $0x178] sm:$0xff]  ;;  %v71_v60 = vrot.slane %v1051_v30, %v70_v32  ;;  %v238_v5 = vld [vmem:[#allocation7 + $0x208] sm:$0xff] }
  0x4e   :  { %770 = vmatpush3.bf16.msra.mxu0 %v769_v20  ;;  %v96_v43 = vsub.f32 %v1049_v29, %v67_v35  ;;  %v146_v44 = vsub.f32 %v117_v36, %v1049_v29  ;;  %v95_v46 = vsub.f32 %v1049_v29, %v63_v37  ;;  %v145_v47 = vsub.f32 %v113_v38, %v1049_v29  ;;  %v255_v9 = vld [vmem:[#allocation7 + $0x290] sm:$0xff]  ;;  %v256_v10 = vld [vmem:[#allocation7 + $0x298] sm:$0xff]  ;;  %v269_v15 = vld [vmem:[#allocation7 + $0x300] sm:$0xff] }
  0x4f   :  { %772 = vmatprep.subr.bf16.mxu0 %v771_v22  ;;  %v98_v52 = vsub.f32 %v1049_v29, %v75_v41  ;;  %v148_v53 = vsub.f32 %v125_v42, %v1049_v29  ;;  %v121_v62 = vrot.slane %v1053_v31, %v70_v32  ;;  %v809_v0 = vpack.c.bf16 %v220_v49, %v219_v45  ;;  %v270_v16 = vld [vmem:[#allocation7 + $0x308] sm:$0xff]  ;;  %v240_v22 = vld [vmem:[#allocation7 + $0x218] sm:$0xff]  ;;  %v257_v25 = vld [vmem:[#allocation7 + $0x2a0] sm:$0xff] }
  0x50   :  { %802 = vmatpush3.bf16.msra.mxu1 %v801_v21  ;;  %v103_v54 = vmax.f32 %v96_v43, 0.0  ;;  %v153_v55 = vmax.f32 %v146_v44, 0.0  ;;  %v102_v56 = vmax.f32 %v95_v46, 0.0  ;;  %v152_v57 = vmax.f32 %v145_v47, 0.0  ;;  %v239_v21 = vld [vmem:[#allocation7 + $0x210] sm:$0xff]  ;;  %v272_v32 = vld [vmem:[#allocation7 + $0x318] sm:$0xff] }
  0x51   :  { %804 = vmatprep.subr.bf16.mxu1 %v803_v27  ;;  %v105_v58 = vmax.f32 %v98_v52, 0.0  ;;  %v155_v59 = vmax.f32 %v148_v53, 0.0  ;;  %v811_v2 = vpack.c.bf16 %v254_v51, %v253_v50  ;;  %v97_v6 = vsub.f32 %v1049_v29, %v71_v60  ;;  %v241_v37 = vld [vmem:[#allocation7 + $0x220] sm:$0xff]  ;;  %v242_v38 = vld [vmem:[#allocation7 + $0x228] sm:$0xff]  ;;  %v260_v41 = vld [vmem:[#allocation7 + $0x2b8] sm:$0xff] }
  0x52   :  { %774 = vmatpush3.bf16.msra.mxu0 %v773_v26  ;;  %v160_v63 = vmul.f32 %v153_v55, %v103_v54  ;;  %v159_v1 = vmul.f32 %v152_v57, %v102_v56  ;;  %v147_v7 = vsub.f32 %v121_v62, %v1049_v29  ;;  %v813_v17 = vpack.c.bf16 %v238_v5, %v237_v4  ;;  %v258_v26 = vld [vmem:[#allocation7 + $0x2a8] sm:$0xff]  ;;  %v273_v44 = vld [vmem:[#allocation7 + $0x320] sm:$0xff]  ;;  %v243_v51 = vld [vmem:[#allocation7 + $0x230] sm:$0xff] }
  0x53   :  { %776 = vmatprep.subr.bf16.mxu0 %v775_v39  ;;  %v162_v3 = vmul.f32 %v155_v59, %v105_v58  ;;  %v104_v13 = vmax.f32 %v97_v6, 0.0  ;;  %v815_v20 = vpack.c.bf16 %v256_v10, %v255_v9  ;;  %v844_v24 = vpack.c.bf16 %v270_v16, %v269_v15  ;;  %v274_v45 = vld [vmem:[#allocation7 + $0x328] sm:$0xff]  ;;  %v244_v52 = vld [vmem:[#allocation7 + $0x238] sm:$0xff]  ;;  %v261_v54 = vld [vmem:[#allocation7 + $0x2c0] sm:$0xff] }
  0x54   :  { %806 = vmatpush3.bf16.msra.mxu1 %v805_v28  ;;  %v167_v8 = vmul.f32 %v160_v63, %v160_v63  ;;  %v166_v11 = vmul.f32 %v159_v1, %v159_v1  ;;  %v154_v14 = vmax.f32 %v147_v7, 0.0  ;;  %v271_v28 = vld [vmem:[#allocation7 + $0x310] sm:$0xff]  ;;  %v817_v33 = vpack.c.bf16 %v240_v22, %v239_v21  ;;  %v262_v55 = vld [vmem:[#allocation7 + $0x2c8] sm:$0xff]  ;;  %v276_v58 = vld [vmem:[#allocation7 + $0x338] sm:$0xff] }
  0x55   :  { %808 = vmatprep.subr.bf16.mxu1 %v807_v48  ;;  %v169_v12 = vmul.f32 %v162_v3, %v162_v3  ;;  %v83_v34 = vrot.slane %v1051_v30, %v82_v18  ;;  %v133_v35 = vrot.slane %v1053_v31, %v82_v18  ;;  %v819_v36 = vpack.c.bf16 %v258_v26, %v257_v25  ;;  %v275_v57 = vld [vmem:[#allocation7 + $0x330] sm:$0xff]  ;;  %v246_v1 = vld [vmem:[#allocation7 + $0x248] sm:$0xff]  ;;  %v264_v5 = vld [vmem:[#allocation7 + $0x2d8] sm:$0xff] }
  0x56   :  { %778 = vmatpush3.bf16.msra.mxu0 %v777_v40  ;;  %356 = vmatprep.mubr.f32.mxu0 %v167_v8  ;;  %v161_v19 = vmul.f32 %v154_v14, %v104_v13  ;;  %v847_v39 = vpack.c.bf16 %v272_v32, %v271_v28  ;;  %v259_v40 = vld [vmem:[#allocation7 + $0x2b0] sm:$0xff]  ;;  %v977_v46 = vmov 0.0   ;;  %v821_v47 = vpack.c.bf16 %v242_v38, %v241_v37  ;;  %v277_v6 = vld [vmem:[#allocation7 + $0x340] sm:$0xff]  ;;  %v278_v7 = vld [vmem:[#allocation7 + $0x348] sm:$0xff] }
  0x57   :  { %812 = vmatprep.subr.bf16.mxu0 %v811_v2  ;;  %426 = vmatprep.mubr.f32.mxu1 %v169_v12  ;;  %v100_v42 = vsub.f32 %v1049_v29, %v83_v34  ;;  %v150_v43 = vsub.f32 %v133_v35, %v1049_v29  ;;  %v823_v50 = vpack.c.bf16 %v260_v41, %v259_v40  ;;  %v78_v59 = vsub.s32 4, %v1040_v61  ;;  %v263_v4 = vld [vmem:[#allocation7 + $0x2d0] sm:$0xff]  ;;  %v248_v13 = vld [vmem:[#allocation7 + $0x258] sm:$0xff]  ;;  %v265_v16 = vld [vmem:[#allocation7 + $0x2e0] sm:$0xff] }
  0x58   :  { %810 = vmatpush3.bf16.msra.mxu1 %v809_v0  ;;  %v168_v27 = vmul.f32 %v161_v19, %v161_v19  ;;  %v850_v53 = vpack.c.bf16 %v274_v45, %v273_v44  ;;  %v825_v60 = vpack.c.bf16 %v244_v52, %v243_v51  ;;  %v827_v63 = vpack.c.bf16 %v262_v55, %v261_v54  ;;  %v245_v0 = vld [vmem:[#allocation7 + $0x240] sm:$0xff]  ;;  %v247_v12 = vld [vmem:[#allocation7 + $0x250] sm:$0xff]  ;;  %v280_v19 = vld [vmem:[#allocation7 + $0x358] sm:$0xff] }
  0x59   :  { %843 = vmatprep.subr.bf16.mxu1 %v975_v23  ;;  %357 = vmatmul.mubr.f32.vlgmr.msra.gmra.mrb[0].mxu0 %v166_v11  ;;  %v107_v48 = vmax.f32 %v100_v42, 0.0  ;;  %v157_v49 = vmax.f32 %v150_v43, 0.0  ;;  %v86_v2 = vsub.s32 6, %v1040_v61  ;;  %v853_v3 = vpack.c.bf16 %v276_v58, %v275_v57  ;;  %v279_v18 = vld [vmem:[#allocation7 + $0x350] sm:$0xff]  ;;  %v249_v25 = vld [vmem:[#allocation7 + $0x260] sm:$0xff]  ;;  %v268_v32 = vld [vmem:[#allocation7 + $0x2f8] sm:$0xff] }
  0x5a   :  { %814 = vmatpush3.bf16.msra.mxu0 %v813_v17  ;;  %v79_v8 = vrot.slane %v1051_v30, %v78_v59  ;;  %v129_v9 = vrot.slane %v1053_v31, %v78_v59  ;;  %v829_v10 = vpack.c.bf16 %v246_v1, %v245_v0  ;;  %v831_v11 = vpack.c.bf16 %v264_v5, %v263_v4  ;;  %v266_v17 = vld [vmem:[#allocation7 + $0x2e8] sm:$0xff]  ;;  %v267_v28 = vld [vmem:[#allocation7 + $0x2f0] sm:$0xff]  ;;  %v252_v40 = vld [vmem:[#allocation7 + $0x278] sm:$0xff] }
  0x5b   :  { %427 = vmatmul.mubr.f32.vlgmr.msra.gmra.mrb[0].mxu1 %v168_v27  ;;  %816 = vmatprep.subr.bf16.mxu0 %v815_v20  ;;  %v164_v56 = vmul.f32 %v157_v49, %v107_v48  ;;  %v87_v61 = vrot.slane %v1051_v30, %v86_v2  ;;  %v137_v14 = vrot.slane %v1053_v31, %v86_v2  ;;  %v250_v30 = vld [vmem:[#allocation7 + $0x268] sm:$0xff]  ;;  %v283_v44 = vld [vmem:[#allocation7 + $0x370] sm:$0xff]  ;;  %v284_v45 = vld [vmem:[#allocation7 + $0x378] sm:$0xff] }
  0x5c   :  { %845 = vmatpush3.bf16.msra.mxu1 %v844_v24  ;;  %744 = vmatprep.mubr.msk.f32.mxu1 %vm976_vm0, %v977_v46  ;;  %v856_v15 = vpack.c.bf16 %v278_v7, %v277_v6  ;;  %v99_v20 = vsub.f32 %v1049_v29, %v79_v8  ;;  %v149_v21 = vsub.f32 %v129_v9, %v1049_v29  ;;  %v282_v34 = vld [vmem:[#allocation7 + $0x368] sm:$0xff] }
  0x5d   :  { %846 = vmatprep.subr.bf16.mxu1 %v975_v23  ;;  %v171_v62 = vmul.f32 %v164_v56, %v164_v56  ;;  %v833_v22 = vpack.c.bf16 %v248_v13, %v247_v12  ;;  %v835_v24 = vpack.c.bf16 %v266_v17, %v265_v16  ;;  %v101_v31 = vsub.f32 %v1049_v29, %v87_v61  ;;  %v589_v52 = vld [vmem:[%s1115_s3] ss:$0 sm:$0xff] }
  0x5e   :  { %818 = vmatpush3.bf16.msra.mxu0 %v817_v33  ;;  %v151_v26 = vsub.f32 %v137_v14, %v1049_v29  ;;  %v859_v27 = vpack.c.bf16 %v280_v19, %v279_v18  ;;  %v281_v33 = vld [vmem:[#allocation7 + $0x360] sm:$0xff]  ;;  %v106_v35 = vmax.f32 %v99_v20, 0.0  ;;  %v837_v37 = vpack.c.bf16 %v250_v30, %v249_v25 }
  0x5f   :  { %820 = vmatprep.subr.bf16.mxu0 %v819_v36  ;;  %496 = vmatprep.mubr.f32.mxu0 %v171_v62  ;;  %v156_v36 = vmax.f32 %v149_v21, 0.0  ;;  %v839_v38 = vpack.c.bf16 %v268_v32, %v267_v28  ;;  %v108_v41 = vmax.f32 %v101_v31, 0.0  ;;  %v862_v29 = vpack.c.bf16 %v282_v34, %v281_v33 }
  0x60   :  { %848 = vmatpush3.bf16.msra.mxu1 %v847_v39  ;;  %v251_v39 = vld [vmem:[#allocation7 + $0x270] sm:$0xff]  ;;  %v158_v42 = vmax.f32 %v151_v26, 0.0  ;;  %v865_v48 = vpack.c.bf16 %v284_v45, %v283_v44 }
  0x61   :  { %849 = vmatprep.subr.bf16.mxu1 %v975_v23  ;;  %v163_v43 = vmul.f32 %v156_v36, %v106_v35  ;;  %v841_v46 = vpack.c.bf16 %v252_v40, %v251_v39 }
  0x62   :  { %822 = vmatpush3.bf16.msra.mxu0 %v821_v47  ;;  %v165_v47 = vmul.f32 %v158_v42, %v108_v41 }
  0x63   :  { %824 = vmatprep.subr.bf16.mxu0 %v823_v50  ;;  %v170_v49 = vmul.f32 %v163_v43, %v163_v43 }
  0x64   :  { %851 = vmatpush3.bf16.msra.mxu1 %v850_v53  ;;  %v172_v50 = vmul.f32 %v165_v47, %v165_v47 }
  0x65   :  { %852 = vmatprep.subr.bf16.mxu1 %v975_v23 }
  0x66   :  { %826 = vmatpush3.bf16.msra.mxu0 %v825_v60 }
  0x67   :  { %828 = vmatprep.subr.bf16.mxu0 %v827_v63 }
  0x68   :  { %854 = vmatpush3.bf16.msra.mxu1 %v853_v3 }
  0x69   :  { %855 = vmatprep.subr.bf16.mxu1 %v975_v23 }
  0x6a   :  { %830 = vmatpush3.bf16.msra.mxu0 %v829_v10 }
  0x6b   :  { %832 = vmatprep.subr.bf16.mxu0 %v831_v11 }
  0x6c   :  { %857 = vmatpush3.bf16.msra.mxu1 %v856_v15 }
  0x6d   :  { %858 = vmatprep.subr.bf16.mxu1 %v975_v23 }
  0x6e   :  { %834 = vmatpush3.bf16.msra.mxu0 %v833_v22 }
  0x6f   :  { %836 = vmatprep.subr.bf16.mxu0 %v835_v24 }
  0x70   :  { %860 = vmatpush3.bf16.msra.mxu1 %v859_v27 }
  0x71   :  { %861 = vmatprep.subr.bf16.mxu1 %v975_v23 }
  0x72   :  { %838 = vmatpush3.bf16.msra.mxu0 %v837_v37 }
  0x73   :  { %840 = vmatprep.subr.bf16.mxu0 %v839_v38 }
  0x74   :  { %863 = vmatpush3.bf16.msra.mxu1 %v862_v29 }
  0x75   :  { %864 = vmatprep.subr.bf16.mxu1 %v975_v23 }
  0x76   :  { %842 = vmatpush3.bf16.msra.mxu0 %v841_v46 }
  0x78   :  { %866 = vmatpush3.bf16.msra.mxu1 %v865_v48 }
  0x79   :  { %497 = vmatmul.mubr.f32.vlgmr.msra.gmra.mrb[2].mxu0 %v170_v49 }
  0x7b   :  { %745 = vmatmul.mubr.f32.vlgmr.msra.gmra.mrb[2].mxu1 %v172_v50 }
 0x12c   :  { %v622_v51 = vpop.f32.mrb[0].mxu0 }
 0x12d   :  { %v623_v53 = vpop.f32.mrb[1].mxu0 }
 0x12e   :  { %v624_v54 = vadd.f32 %v623_v53, %v622_v51  ;;  %v657_v55 = vpop.f32.mrb[0].mxu1 }
 0x12f   :  { %v658_v56 = vpop.f32.mrb[1].mxu1 }
 0x130   :  { %v359_v57 = vadd.f32 %v624_v54, %v589_v52  ;;  %v659_v58 = vadd.f32 %v658_v56, %v657_v55 }
 0x132   :  { %v429_v59 = vadd.f32 %v659_v58, %v359_v57 }
 0x14c   :  { %v692_v60 = vpop.f32.mrb[2].mxu0 }
 0x14d   :  { %v693_v62 = vpop.f32.mrb[3].mxu0 }
 0x14e   :  { %v694_v23 = vadd.f32 %v693_v62, %v692_v60  ;;  %v568_v63 = vpop.f32.mrb[2].mxu1 }
 0x14f   :  { %v746_v0 = vpop.f32.mrb[3].mxu1 }
 0x150   :  { %v499_v1 = vadd.f32 %v694_v23, %v429_v59 }
 0x152   :  { %v569_v2 = vadd.f32 %v568_v63, %v499_v1 }
 0x154   :  { %572 = vst [vmem:[#allocation8] sm:$0xff] %v569_v2 }
 0x155   :  { %953 = shalt.err (!%p950_p0)
}
 0x156   :  { %s954_s30 = scalar_lea.hbm %s1116_s4, 128 }
 0x157   :  { %p955_p1 = scmp.ne.s32.totalorder %s1116_s4, %s954_s30  ;;  %p958_p2 = scmp.lt.u32.totalorder %s954_s30, %s1116_s4 }
 0x159   :  { %p960_p3 = pnand %p958_p2, %p955_p1 }
 0x15b   :  { %963 = shalt.err (!%p960_p3)
}
 0x15c   :  { %582 = dma.vmem_to_hbm [thread:$0]  %s580_s27, 128, %s1116_s4, [#allocation4]  }
 0x15d   :  { %968 = dma.done.wait [#allocation4], 128  }
 0x15e   :  { %969 = vsyncadd [#allocation4], 4294967168 }
 0x15f   :  { %586 = vsyncpa [#allocation3], 1 }
 0x160   :  { %587 = vsyncpa [#allocation6], 1 }
 0x161   :  { %588 = vsyncpa [#allocation4], 1 }

// kernel: tpu_custom_call.1
= control target key start
LH: loop header
LB: loop body
LE: loop exit
PB: predicated region body
PF: predicated region fallthrough
CT: control target
= control target key end

     0   :  { %9 = vsyncpa [#allocation3], 0  ;;  %s1112_s0 = inlined_call_operand.hbm [shape: f32[8,128], index: 0, kind: input, shape index: {}]   ;;  %s1113_s1 = inlined_call_operand.hbm [shape: f32[2,896], index: 1, kind: input, shape index: {}]   ;;  %s1114_s2 = inlined_call_operand.hbm [shape: f32[896,128], index: 2, kind: input, shape index: {}]   ;;  %s1115_s3 = inlined_call_operand.vmem [shape: f32[1,128], index: 3, kind: input, shape index: {}]   ;;  %s1116_s4 = inlined_call_operand.hbm [shape: f32[8,128], index: 4, kind: output, shape index: {}]  }
   0x1   :  { %10 = vsyncpa [#allocation6], 0 }
   0x2   :  { %11 = vsyncpa [#allocation4], 0  ;;  %s970_s15 = smov [#allocation5]   ;;  %s971_s17 = smov [#allocation2]  }
   0x3   :  { %s28_s16 = sshll.u32 %s970_s15, 4  ;;  %s18_s18 = sshll.u32 %s971_s17, 4  ;;  %s29_s16 = int_to_ptr.vmem [resolvable:$true] %s28_s16  ;;  %s19_s18 = int_to_ptr.vmem [resolvable:$true] %s18_s18 }
   0x4   :  { %s876_s21 = scalar_lea.hbm %s1113_s1, 224 }
   0x5   :  { %p877_p0 = scmp.ne.s32.totalorder %s1113_s1, %s876_s21  ;;  %p880_p1 = scmp.lt.u32.totalorder %s876_s21, %s1113_s1 }
   0x7   :  { %p882_p2 = pnand %p880_p1, %p877_p0 }
   0x9   :  { %885 = shalt.err (!%p882_p2)
}
   0xa   :  { %s886_s26 = scalar_lea.vmem %s29_s16, 224  ;;  %p891_p4 = scmp.lt.s32.totalorder %s29_s16, %s29_s16 }
   0xb   :  { %p887_p3 = scmp.ne.s32.totalorder %s29_s16, %s886_s26  ;;  %p892_p5 = scmp.lt.s32.totalorder %s886_s26, %s886_s26 }
   0xd   :  { %p893_p6 = por %p892_p5, %p891_p4 }
   0xf   :  { %p894_p7 = pnand %p893_p6, %p887_p3 }
  0x11   :  { %897 = shalt.err (!%p894_p7)
}
  0x12   :  { %31 = dma.hbm_to_vmem [thread:$0]  %s1113_s1, 224, %s29_s16, [#allocation6]  }
  0x13   :  { %s898_s5 = scalar_lea.hbm %s1112_s0, 128 }
  0x14   :  { %p899_p8 = scmp.ne.s32.totalorder %s1112_s0, %s898_s5  ;;  %p902_p9 = scmp.lt.u32.totalorder %s898_s5, %s1112_s0 }
  0x16   :  { %p904_p10 = pnand %p902_p9, %p899_p8 }
  0x18   :  { %907 = shalt.err (!%p904_p10)
}
  0x19   :  { %s908_s10 = scalar_lea.vmem %s19_s18, 128  ;;  %p913_p12 = scmp.lt.s32.totalorder %s19_s18, %s19_s18 }
  0x1a   :  { %p909_p11 = scmp.ne.s32.totalorder %s19_s18, %s908_s10  ;;  %p914_p13 = scmp.lt.s32.totalorder %s908_s10, %s908_s10 }
  0x1c   :  { %p915_p0 = por %p914_p13, %p913_p12 }
  0x1e   :  { %p916_p1 = pnand %p915_p0, %p909_p11 }
  0x20   :  { %919 = shalt.err (!%p916_p1)
}
  0x21   :  { %21 = dma.hbm_to_vmem [thread:$0]  %s1112_s0, 128, %s19_s18, [#allocation3]  }
  0x22   :  { %s972_s12 = smov [#allocation7]   ;;  %s920_s16 = scalar_lea.hbm %s1114_s2, 14336 }
  0x23   :  { %s37_s13 = sshll.u32 %s972_s12, 4  ;;  %p921_p2 = scmp.ne.s32.totalorder %s1114_s2, %s920_s16  ;;  %s38_s13 = int_to_ptr.vmem [resolvable:$true] %s37_s13 }
  0x24   :  { %p924_p3 = scmp.lt.u32.totalorder %s920_s16, %s1114_s2 }
  0x26   :  { %p926_p4 = pnand %p924_p3, %p921_p2 }
  0x28   :  { %929 = shalt.err (!%p926_p4)
}
  0x29   :  { %s930_s22 = scalar_lea.vmem %s38_s13, 14336  ;;  %p935_p6 = scmp.lt.s32.totalorder %s38_s13, %s38_s13 }
  0x2a   :  { %p931_p5 = scmp.ne.s32.totalorder %s38_s13, %s930_s22  ;;  %p936_p7 = scmp.lt.s32.totalorder %s930_s22, %s930_s22 }
  0x2c   :  { %p937_p8 = por %p936_p7, %p935_p6 }
  0x2e   :  { %p938_p9 = pnand %p937_p8, %p931_p5 }
  0x30   :  { %941 = shalt.err (!%p938_p9)
}
  0x31   :  { %s973_s0 = smov 128   ;;  %s974_s18 = smov 8  }
  0x32   :  { %43 = dma.hbm_to_vmem [thread:$0]  %s1114_s2, 14336, %s38_s13, [#allocation6], %s973_s0, %s973_s0, %s974_s18  }
  0x33   :  { %964 = dma.done.wait [#allocation3], 128  }
  0x34   :  { %965 = vsyncadd [#allocation3], 4294967168 }
  0x35   :  { %966 = dma.done.wait [#allocation6], 14560  }
  0x36   :  { %967 = vsyncadd [#allocation6], 4294952736  ;;  %v189_v0 = vld [vmem:[#allocation7 + $0x80] sm:$0xff]  ;;  %v190_v1 = vld [vmem:[#allocation7 + $0x88] sm:$0xff]  ;;  %v60_v47 = vlaneseq  ;;  %vm976_vm0 = vmmov 0   ;;  %s978_s26 = smov [#allocation8]  }
  0x37   :  { %v173_v2 = vld [vmem:[#allocation7] sm:$0xff]  ;;  %v747_v3 = vpack.c.bf16 %v190_v1, %v189_v0  ;;  %v174_v4 = vld [vmem:[#allocation7 + $0x8] sm:$0xff]  ;;  %v191_v11 = vld [vmem:[#allocation7 + $0x90] sm:$0xff]  ;;  %s579_s27 = sshll.u32 %s978_s26, 4  ;;  %s580_s27 = int_to_ptr.vmem [resolvable:$true] %s579_s27 }
  0x38   :  { %v221_v5 = vld [vmem:[#allocation7 + $0x180] sm:$0xff]  ;;  %v222_v6 = vld [vmem:[#allocation7 + $0x188] sm:$0xff]  ;;  %v749_v7 = vpack.c.bf16 %v174_v4, %v173_v2  ;;  %v192_v13 = vld [vmem:[#allocation7 + $0x98] sm:$0xff]  ;;  %v1040_v61 = vshrl.u32 %v60_v47, 7  ;;  %s942_s28 = scalar_lea.vmem %s580_s27, 128  ;;  %p947_p11 = scmp.lt.s32.totalorder %s580_s27, %s580_s27 }
  0x39   :  { %v779_v8 = vpack.c.bf16 %v222_v6, %v221_v5  ;;  %v205_v9 = vld [vmem:[#allocation7 + $0x100] sm:$0xff]  ;;  %v206_v10 = vld [vmem:[#allocation7 + $0x108] sm:$0xff]  ;;  %748 = vmatprep.subr.bf16.mxu0 %v747_v3  ;;  %v175_v14 = vld [vmem:[#allocation7 + $0x10] sm:$0xff]  ;;  %v751_v16 = vpack.c.bf16 %v192_v13, %v191_v11  ;;  %p943_p10 = scmp.ne.s32.totalorder %s580_s27, %s942_s28  ;;  %p948_p12 = scmp.lt.s32.totalorder %s942_s28, %s942_s28 }
  0x3a   :  { %v781_v12 = vpack.c.bf16 %v206_v10, %v205_v9  ;;  %v176_v15 = vld [vmem:[#allocation7 + $0x18] sm:$0xff]  ;;  %750 = vmatpush3.bf16.msra.mxu0 %v749_v7  ;;  %v223_v18 = vld [vmem:[#allocation7 + $0x190] sm:$0xff]  ;;  %v193_v23 = vld [vmem:[#allocation7 + $0xa0] sm:$0xff] }
  0x3b   :  { %780 = vmatprep.subr.bf16.mxu1 %v779_v8  ;;  %v753_v17 = vpack.c.bf16 %v176_v15, %v175_v14  ;;  %v224_v19 = vld [vmem:[#allocation7 + $0x198] sm:$0xff]  ;;  %v207_v20 = vld [vmem:[#allocation7 + $0x110] sm:$0xff]  ;;  %v194_v24 = vld [vmem:[#allocation7 + $0xa8] sm:$0xff]  ;;  %752 = vmatprep.subr.bf16.mxu0 %v751_v16  ;;  %v66_v16 = vsub.s32 1, %v1040_v61  ;;  %p949_p13 = por %p948_p12, %p947_p11 }
  0x3c   :  { %782 = vmatpush3.bf16.msra.mxu1 %v781_v12  ;;  %v783_v21 = vpack.c.bf16 %v224_v19, %v223_v18  ;;  %v208_v22 = vld [vmem:[#allocation7 + $0x118] sm:$0xff]  ;;  %v755_v26 = vpack.c.bf16 %v194_v24, %v193_v23  ;;  %v177_v27 = vld [vmem:[#allocation7 + $0x20] sm:$0xff]  ;;  %v178_v28 = vld [vmem:[#allocation7 + $0x28] sm:$0xff]  ;;  %v74_v19 = vsub.s32 3, %v1040_v61 }
  0x3d   :  { %v785_v25 = vpack.c.bf16 %v208_v22, %v207_v20  ;;  %v225_v29 = vld [vmem:[#allocation7 + $0x1a0] sm:$0xff]  ;;  %v226_v30 = vld [vmem:[#allocation7 + $0x1a8] sm:$0xff]  ;;  %v757_v33 = vpack.c.bf16 %v178_v28, %v177_v27  ;;  %v195_v35 = vld [vmem:[#allocation7 + $0xb0] sm:$0xff]  ;;  %p950_p0 = pnand %p949_p13, %p943_p10 }
  0x3e   :  { %784 = vmatprep.subr.bf16.mxu1 %v783_v21  ;;  %v209_v31 = vld [vmem:[#allocation7 + $0x120] sm:$0xff]  ;;  %v210_v32 = vld [vmem:[#allocation7 + $0x128] sm:$0xff]  ;;  %754 = vmatpush3.bf16.msra.mxu0 %v753_v17  ;;  %v787_v34 = vpack.c.bf16 %v226_v30, %v225_v29  ;;  %v196_v36 = vld [vmem:[#allocation7 + $0xb8] sm:$0xff]  ;;  %v62_v17 = vsub.s32 0, %v1040_v61 }
  0x3f   :  { %v179_v37 = vld [vmem:[#allocation7 + $0x30] sm:$0xff]  ;;  %756 = vmatprep.subr.bf16.mxu0 %v755_v26  ;;  %v789_v38 = vpack.c.bf16 %v210_v32, %v209_v31  ;;  %v759_v39 = vpack.c.bf16 %v196_v36, %v195_v35  ;;  %v180_v40 = vld [vmem:[#allocation7 + $0x38] sm:$0xff]  ;;  %v197_v46 = vld [vmem:[#allocation7 + $0xc0] sm:$0xff]  ;;  %v70_v32 = vsub.s32 2, %v1040_v61 }
  0x40   :  { %786 = vmatpush3.bf16.msra.mxu1 %v785_v25  ;;  %v227_v41 = vld [vmem:[#allocation7 + $0x1b0] sm:$0xff]  ;;  %v228_v42 = vld [vmem:[#allocation7 + $0x1b8] sm:$0xff]  ;;  %v198_v48 = vld [vmem:[#allocation7 + $0xc8] sm:$0xff]  ;;  %v761_v49 = vpack.c.bf16 %v180_v40, %v179_v37 }
  0x41   :  { %788 = vmatprep.subr.bf16.mxu1 %v787_v34  ;;  %v791_v43 = vpack.c.bf16 %v228_v42, %v227_v41  ;;  %v211_v44 = vld [vmem:[#allocation7 + $0x130] sm:$0xff]  ;;  %v212_v45 = vld [vmem:[#allocation7 + $0x138] sm:$0xff]  ;;  %v229_v50 = vld [vmem:[#allocation7 + $0x1c0] sm:$0xff]  ;;  %v763_v53 = vpack.c.bf16 %v198_v48, %v197_v46 }
  0x42   :  { %758 = vmatpush3.bf16.msra.mxu0 %v757_v33  ;;  %v230_v51 = vld [vmem:[#allocation7 + $0x1c8] sm:$0xff]  ;;  %v793_v52 = vpack.c.bf16 %v212_v45, %v211_v44  ;;  %v181_v54 = vld [vmem:[#allocation7 + $0x40] sm:$0xff]  ;;  %v199_v59 = vld [vmem:[#allocation7 + $0xd0] sm:$0xff] }
  0x43   :  { %760 = vmatprep.subr.bf16.mxu0 %v759_v39  ;;  %v182_v55 = vld [vmem:[#allocation7 + $0x48] sm:$0xff]  ;;  %v213_v56 = vld [vmem:[#allocation7 + $0x140] sm:$0xff]  ;;  %v795_v57 = vpack.c.bf16 %v230_v51, %v229_v50  ;;  %v200_v60 = vld [vmem:[#allocation7 + $0xd8] sm:$0xff] }
  0x44   :  { %790 = vmatpush3.bf16.msra.mxu1 %v789_v38  ;;  %v214_v58 = vld [vmem:[#allocation7 + $0x148] sm:$0xff]  ;;  %v183_v62 = vld [vmem:[#allocation7 + $0x50] sm:$0xff]  ;;  %v184_v63 = vld [vmem:[#allocation7 + $0x58] sm:$0xff]  ;;  %v765_v3 = vpack.c.bf16 %v182_v55, %v181_v54  ;;  %v767_v8 = vpack.c.bf16 %v200_v60, %v199_v59 }
  0x45   :  { %792 = vmatprep.subr.bf16.mxu1 %v791_v43  ;;  %v231_v0 = vld [vmem:[#allocation7 + $0x1d0] sm:$0xff]  ;;  %v232_v1 = vld [vmem:[#allocation7 + $0x1d8] sm:$0xff]  ;;  %v201_v5 = vld [vmem:[#allocation7 + $0xe0] sm:$0xff]  ;;  %v797_v7 = vpack.c.bf16 %v214_v58, %v213_v56  ;;  %v769_v20 = vpack.c.bf16 %v184_v63, %v183_v62 }
  0x46   :  { %v215_v2 = vld [vmem:[#allocation7 + $0x150] sm:$0xff]  ;;  %762 = vmatpush3.bf16.msra.mxu0 %v761_v49  ;;  %v216_v4 = vld [vmem:[#allocation7 + $0x158] sm:$0xff]  ;;  %v202_v6 = vld [vmem:[#allocation7 + $0xe8] sm:$0xff]  ;;  %v799_v12 = vpack.c.bf16 %v232_v1, %v231_v0 }
  0x47   :  { %764 = vmatprep.subr.bf16.mxu0 %v763_v53  ;;  %v185_v9 = vld [vmem:[#allocation7 + $0x60] sm:$0xff]  ;;  %v186_v10 = vld [vmem:[#allocation7 + $0x68] sm:$0xff]  ;;  %v203_v18 = vld [vmem:[#allocation7 + $0xf0] sm:$0xff]  ;;  %v801_v21 = vpack.c.bf16 %v216_v4, %v215_v2  ;;  %v771_v22 = vpack.c.bf16 %v202_v6, %v201_v5 }
  0x48   :  { %794 = vmatpush3.bf16.msra.mxu1 %v793_v52  ;;  %v233_v11 = vld [vmem:[#allocation7 + $0x1e0] sm:$0xff]  ;;  %v234_v13 = vld [vmem:[#allocation7 + $0x1e8] sm:$0xff]  ;;  %v204_v23 = vld [vmem:[#allocation7 + $0xf8] sm:$0xff]  ;;  %v773_v26 = vpack.c.bf16 %v186_v10, %v185_v9 }
  0x49   :  { %796 = vmatprep.subr.bf16.mxu1 %v795_v57  ;;  %v217_v14 = vld [vmem:[#allocation7 + $0x160] sm:$0xff]  ;;  %v218_v15 = vld [vmem:[#allocation7 + $0x168] sm:$0xff]  ;;  %v1045_v24 = vld [vmem:[#allocation7 + $0x70] sm:$0xff]  ;;  %v803_v27 = vpack.c.bf16 %v234_v13, %v233_v11  ;;  %v775_v39 = vpack.c.bf16 %v204_v23, %v203_v18  ;;  %v82_v18 = vsub.s32 5, %v1040_v61  ;;  %v975_v23 = vmov 0.0|0.0  }
  0x4a   :  { %766 = vmatpush3.bf16.msra.mxu0 %v765_v3  ;;  %v1047_v25 = vld [vmem:[#allocation7 + $0x78] sm:$0xff]  ;;  %v805_v28 = vpack.c.bf16 %v218_v15, %v217_v14  ;;  %v1049_v29 = vld [vmem:[#allocation2] sm:$0xff]  ;;  %v253_v50 = vld [vmem:[#allocation7 + $0x280] sm:$0xff] }
  0x4b   :  { %768 = vmatprep.subr.bf16.mxu0 %v767_v8  ;;  %v1051_v30 = vld [vmem:[#allocation5] ss:$2 sm:$0xff]  ;;  %v1053_v31 = vld [vmem:[#allocation5 + $0x1] ss:$2 sm:$0xff]  ;;  %v777_v40 = vpack.c.bf16 %v1047_v25, %v1045_v24  ;;  %v254_v51 = vld [vmem:[#allocation7 + $0x288] sm:$0xff] }
  0x4c   :  { %798 = vmatpush3.bf16.msra.mxu1 %v797_v7  ;;  %v235_v33 = vld [vmem:[#allocation7 + $0x1f0] sm:$0xff]  ;;  %v236_v34 = vld [vmem:[#allocation7 + $0x1f8] sm:$0xff]  ;;  %v67_v35 = vrot.slane %v1051_v30, %v66_v16  ;;  %v117_v36 = vrot.slane %v1053_v31, %v66_v16  ;;  %v63_v37 = vrot.slane %v1051_v30, %v62_v17  ;;  %v113_v38 = vrot.slane %v1053_v31, %v62_v17  ;;  %v237_v4 = vld [vmem:[#allocation7 + $0x200] sm:$0xff] }
  0x4d   :  { %800 = vmatprep.subr.bf16.mxu1 %v799_v12  ;;  %v75_v41 = vrot.slane %v1051_v30, %v74_v19  ;;  %v125_v42 = vrot.slane %v1053_v31, %v74_v19  ;;  %v219_v45 = vld [vmem:[#allocation7 + $0x170] sm:$0xff]  ;;  %v807_v48 = vpack.c.bf16 %v236_v34, %v235_v33  ;;  %v220_v49 = vld [vmem:[#allocation7 + $0x178] sm:$0xff]  ;;  %v71_v60 = vrot.slane %v1051_v30, %v70_v32  ;;  %v238_v5 = vld [vmem:[#allocation7 + $0x208] sm:$0xff] }
  0x4e   :  { %770 = vmatpush3.bf16.msra.mxu0 %v769_v20  ;;  %v96_v43 = vsub.f32 %v1049_v29, %v67_v35  ;;  %v146_v44 = vsub.f32 %v117_v36, %v1049_v29  ;;  %v95_v46 = vsub.f32 %v1049_v29, %v63_v37  ;;  %v145_v47 = vsub.f32 %v113_v38, %v1049_v29  ;;  %v255_v9 = vld [vmem:[#allocation7 + $0x290] sm:$0xff]  ;;  %v256_v10 = vld [vmem:[#allocation7 + $0x298] sm:$0xff]  ;;  %v269_v15 = vld [vmem:[#allocation7 + $0x300] sm:$0xff] }
  0x4f   :  { %772 = vmatprep.subr.bf16.mxu0 %v771_v22  ;;  %v98_v52 = vsub.f32 %v1049_v29, %v75_v41  ;;  %v148_v53 = vsub.f32 %v125_v42, %v1049_v29  ;;  %v121_v62 = vrot.slane %v1053_v31, %v70_v32  ;;  %v809_v0 = vpack.c.bf16 %v220_v49, %v219_v45  ;;  %v270_v16 = vld [vmem:[#allocation7 + $0x308] sm:$0xff]  ;;  %v240_v22 = vld [vmem:[#allocation7 + $0x218] sm:$0xff]  ;;  %v257_v25 = vld [vmem:[#allocation7 + $0x2a0] sm:$0xff] }
  0x50   :  { %802 = vmatpush3.bf16.msra.mxu1 %v801_v21  ;;  %v103_v54 = vmax.f32 %v96_v43, 0.0  ;;  %v153_v55 = vmax.f32 %v146_v44, 0.0  ;;  %v102_v56 = vmax.f32 %v95_v46, 0.0  ;;  %v152_v57 = vmax.f32 %v145_v47, 0.0  ;;  %v239_v21 = vld [vmem:[#allocation7 + $0x210] sm:$0xff]  ;;  %v272_v32 = vld [vmem:[#allocation7 + $0x318] sm:$0xff] }
  0x51   :  { %804 = vmatprep.subr.bf16.mxu1 %v803_v27  ;;  %v105_v58 = vmax.f32 %v98_v52, 0.0  ;;  %v155_v59 = vmax.f32 %v148_v53, 0.0  ;;  %v811_v2 = vpack.c.bf16 %v254_v51, %v253_v50  ;;  %v97_v6 = vsub.f32 %v1049_v29, %v71_v60  ;;  %v241_v37 = vld [vmem:[#allocation7 + $0x220] sm:$0xff]  ;;  %v242_v38 = vld [vmem:[#allocation7 + $0x228] sm:$0xff]  ;;  %v260_v41 = vld [vmem:[#allocation7 + $0x2b8] sm:$0xff] }
  0x52   :  { %774 = vmatpush3.bf16.msra.mxu0 %v773_v26  ;;  %v160_v63 = vmul.f32 %v153_v55, %v103_v54  ;;  %v159_v1 = vmul.f32 %v152_v57, %v102_v56  ;;  %v147_v7 = vsub.f32 %v121_v62, %v1049_v29  ;;  %v813_v17 = vpack.c.bf16 %v238_v5, %v237_v4  ;;  %v258_v26 = vld [vmem:[#allocation7 + $0x2a8] sm:$0xff]  ;;  %v273_v44 = vld [vmem:[#allocation7 + $0x320] sm:$0xff]  ;;  %v243_v51 = vld [vmem:[#allocation7 + $0x230] sm:$0xff] }
  0x53   :  { %776 = vmatprep.subr.bf16.mxu0 %v775_v39  ;;  %v162_v3 = vmul.f32 %v155_v59, %v105_v58  ;;  %v104_v13 = vmax.f32 %v97_v6, 0.0  ;;  %v815_v20 = vpack.c.bf16 %v256_v10, %v255_v9  ;;  %v844_v24 = vpack.c.bf16 %v270_v16, %v269_v15  ;;  %v274_v45 = vld [vmem:[#allocation7 + $0x328] sm:$0xff]  ;;  %v244_v52 = vld [vmem:[#allocation7 + $0x238] sm:$0xff]  ;;  %v261_v54 = vld [vmem:[#allocation7 + $0x2c0] sm:$0xff] }
  0x54   :  { %806 = vmatpush3.bf16.msra.mxu1 %v805_v28  ;;  %v167_v8 = vmul.f32 %v160_v63, %v160_v63  ;;  %v166_v11 = vmul.f32 %v159_v1, %v159_v1  ;;  %v154_v14 = vmax.f32 %v147_v7, 0.0  ;;  %v271_v28 = vld [vmem:[#allocation7 + $0x310] sm:$0xff]  ;;  %v817_v33 = vpack.c.bf16 %v240_v22, %v239_v21  ;;  %v262_v55 = vld [vmem:[#allocation7 + $0x2c8] sm:$0xff]  ;;  %v276_v58 = vld [vmem:[#allocation7 + $0x338] sm:$0xff] }
  0x55   :  { %808 = vmatprep.subr.bf16.mxu1 %v807_v48  ;;  %v169_v12 = vmul.f32 %v162_v3, %v162_v3  ;;  %v83_v34 = vrot.slane %v1051_v30, %v82_v18  ;;  %v133_v35 = vrot.slane %v1053_v31, %v82_v18  ;;  %v819_v36 = vpack.c.bf16 %v258_v26, %v257_v25  ;;  %v275_v57 = vld [vmem:[#allocation7 + $0x330] sm:$0xff]  ;;  %v246_v1 = vld [vmem:[#allocation7 + $0x248] sm:$0xff]  ;;  %v264_v5 = vld [vmem:[#allocation7 + $0x2d8] sm:$0xff] }
  0x56   :  { %778 = vmatpush3.bf16.msra.mxu0 %v777_v40  ;;  %356 = vmatprep.mubr.f32.mxu0 %v167_v8  ;;  %v161_v19 = vmul.f32 %v154_v14, %v104_v13  ;;  %v847_v39 = vpack.c.bf16 %v272_v32, %v271_v28  ;;  %v259_v40 = vld [vmem:[#allocation7 + $0x2b0] sm:$0xff]  ;;  %v977_v46 = vmov 0.0   ;;  %v821_v47 = vpack.c.bf16 %v242_v38, %v241_v37  ;;  %v277_v6 = vld [vmem:[#allocation7 + $0x340] sm:$0xff]  ;;  %v278_v7 = vld [vmem:[#allocation7 + $0x348] sm:$0xff] }
  0x57   :  { %812 = vmatprep.subr.bf16.mxu0 %v811_v2  ;;  %426 = vmatprep.mubr.f32.mxu1 %v169_v12  ;;  %v100_v42 = vsub.f32 %v1049_v29, %v83_v34  ;;  %v150_v43 = vsub.f32 %v133_v35, %v1049_v29  ;;  %v823_v50 = vpack.c.bf16 %v260_v41, %v259_v40  ;;  %v78_v59 = vsub.s32 4, %v1040_v61  ;;  %v263_v4 = vld [vmem:[#allocation7 + $0x2d0] sm:$0xff]  ;;  %v248_v13 = vld [vmem:[#allocation7 + $0x258] sm:$0xff]  ;;  %v265_v16 = vld [vmem:[#allocation7 + $0x2e0] sm:$0xff] }
  0x58   :  { %810 = vmatpush3.bf16.msra.mxu1 %v809_v0  ;;  %v168_v27 = vmul.f32 %v161_v19, %v161_v19  ;;  %v850_v53 = vpack.c.bf16 %v274_v45, %v273_v44  ;;  %v825_v60 = vpack.c.bf16 %v244_v52, %v243_v51  ;;  %v827_v63 = vpack.c.bf16 %v262_v55, %v261_v54  ;;  %v245_v0 = vld [vmem:[#allocation7 + $0x240] sm:$0xff]  ;;  %v247_v12 = vld [vmem:[#allocation7 + $0x250] sm:$0xff]  ;;  %v280_v19 = vld [vmem:[#allocation7 + $0x358] sm:$0xff] }
  0x59   :  { %843 = vmatprep.subr.bf16.mxu1 %v975_v23  ;;  %357 = vmatmul.mubr.f32.vlgmr.msra.gmra.mrb[0].mxu0 %v166_v11  ;;  %v107_v48 = vmax.f32 %v100_v42, 0.0  ;;  %v157_v49 = vmax.f32 %v150_v43, 0.0  ;;  %v86_v2 = vsub.s32 6, %v1040_v61  ;;  %v853_v3 = vpack.c.bf16 %v276_v58, %v275_v57  ;;  %v279_v18 = vld [vmem:[#allocation7 + $0x350] sm:$0xff]  ;;  %v249_v25 = vld [vmem:[#allocation7 + $0x260] sm:$0xff]  ;;  %v268_v32 = vld [vmem:[#allocation7 + $0x2f8] sm:$0xff] }
  0x5a   :  { %814 = vmatpush3.bf16.msra.mxu0 %v813_v17  ;;  %v79_v8 = vrot.slane %v1051_v30, %v78_v59  ;;  %v129_v9 = vrot.slane %v1053_v31, %v78_v59  ;;  %v829_v10 = vpack.c.bf16 %v246_v1, %v245_v0  ;;  %v831_v11 = vpack.c.bf16 %v264_v5, %v263_v4  ;;  %v266_v17 = vld [vmem:[#allocation7 + $0x2e8] sm:$0xff]  ;;  %v267_v28 = vld [vmem:[#allocation7 + $0x2f0] sm:$0xff]  ;;  %v252_v40 = vld [vmem:[#allocation7 + $0x278] sm:$0xff] }
  0x5b   :  { %427 = vmatmul.mubr.f32.vlgmr.msra.gmra.mrb[0].mxu1 %v168_v27  ;;  %816 = vmatprep.subr.bf16.mxu0 %v815_v20  ;;  %v164_v56 = vmul.f32 %v157_v49, %v107_v48  ;;  %v87_v61 = vrot.slane %v1051_v30, %v86_v2  ;;  %v137_v14 = vrot.slane %v1053_v31, %v86_v2  ;;  %v250_v30 = vld [vmem:[#allocation7 + $0x268] sm:$0xff]  ;;  %v283_v44 = vld [vmem:[#allocation7 + $0x370] sm:$0xff]  ;;  %v284_v45 = vld [vmem:[#allocation7 + $0x378] sm:$0xff] }
  0x5c   :  { %845 = vmatpush3.bf16.msra.mxu1 %v844_v24  ;;  %744 = vmatprep.mubr.msk.f32.mxu1 %vm976_vm0, %v977_v46  ;;  %v856_v15 = vpack.c.bf16 %v278_v7, %v277_v6  ;;  %v99_v20 = vsub.f32 %v1049_v29, %v79_v8  ;;  %v149_v21 = vsub.f32 %v129_v9, %v1049_v29  ;;  %v282_v34 = vld [vmem:[#allocation7 + $0x368] sm:$0xff] }
  0x5d   :  { %846 = vmatprep.subr.bf16.mxu1 %v975_v23  ;;  %v171_v62 = vmul.f32 %v164_v56, %v164_v56  ;;  %v833_v22 = vpack.c.bf16 %v248_v13, %v247_v12  ;;  %v835_v24 = vpack.c.bf16 %v266_v17, %v265_v16  ;;  %v101_v31 = vsub.f32 %v1049_v29, %v87_v61  ;;  %v589_v52 = vld [vmem:[%s1115_s3] ss:$0 sm:$0xff] }
  0x5e   :  { %818 = vmatpush3.bf16.msra.mxu0 %v817_v33  ;;  %v151_v26 = vsub.f32 %v137_v14, %v1049_v29  ;;  %v859_v27 = vpack.c.bf16 %v280_v19, %v279_v18  ;;  %v281_v33 = vld [vmem:[#allocation7 + $0x360] sm:$0xff]  ;;  %v106_v35 = vmax.f32 %v99_v20, 0.0  ;;  %v837_v37 = vpack.c.bf16 %v250_v30, %v249_v25 }
  0x5f   :  { %820 = vmatprep.subr.bf16.mxu0 %v819_v36  ;;  %496 = vmatprep.mubr.f32.mxu0 %v171_v62  ;;  %v156_v36 = vmax.f32 %v149_v21, 0.0  ;;  %v839_v38 = vpack.c.bf16 %v268_v32, %v267_v28  ;;  %v108_v41 = vmax.f32 %v101_v31, 0.0  ;;  %v862_v29 = vpack.c.bf16 %v282_v34, %v281_v33 }
  0x60   :  { %848 = vmatpush3.bf16.msra.mxu1 %v847_v39  ;;  %v251_v39 = vld [vmem:[#allocation7 + $0x270] sm:$0xff]  ;;  %v158_v42 = vmax.f32 %v151_v26, 0.0  ;;  %v865_v48 = vpack.c.bf16 %v284_v45, %v283_v44 }
  0x61   :  { %849 = vmatprep.subr.bf16.mxu1 %v975_v23  ;;  %v163_v43 = vmul.f32 %v156_v36, %v106_v35  ;;  %v841_v46 = vpack.c.bf16 %v252_v40, %v251_v39 }
  0x62   :  { %822 = vmatpush3.bf16.msra.mxu0 %v821_v47  ;;  %v165_v47 = vmul.f32 %v158_v42, %v108_v41 }
  0x63   :  { %824 = vmatprep.subr.bf16.mxu0 %v823_v50  ;;  %v170_v49 = vmul.f32 %v163_v43, %v163_v43 }
  0x64   :  { %851 = vmatpush3.bf16.msra.mxu1 %v850_v53  ;;  %v172_v50 = vmul.f32 %v165_v47, %v165_v47 }
  0x65   :  { %852 = vmatprep.subr.bf16.mxu1 %v975_v23 }
  0x66   :  { %826 = vmatpush3.bf16.msra.mxu0 %v825_v60 }
  0x67   :  { %828 = vmatprep.subr.bf16.mxu0 %v827_v63 }
  0x68   :  { %854 = vmatpush3.bf16.msra.mxu1 %v853_v3 }
  0x69   :  { %855 = vmatprep.subr.bf16.mxu1 %v975_v23 }
  0x6a   :  { %830 = vmatpush3.bf16.msra.mxu0 %v829_v10 }
  0x6b   :  { %832 = vmatprep.subr.bf16.mxu0 %v831_v11 }
  0x6c   :  { %857 = vmatpush3.bf16.msra.mxu1 %v856_v15 }
  0x6d   :  { %858 = vmatprep.subr.bf16.mxu1 %v975_v23 }
  0x6e   :  { %834 = vmatpush3.bf16.msra.mxu0 %v833_v22 }
  0x6f   :  { %836 = vmatprep.subr.bf16.mxu0 %v835_v24 }
  0x70   :  { %860 = vmatpush3.bf16.msra.mxu1 %v859_v27 }
  0x71   :  { %861 = vmatprep.subr.bf16.mxu1 %v975_v23 }
  0x72   :  { %838 = vmatpush3.bf16.msra.mxu0 %v837_v37 }
  0x73   :  { %840 = vmatprep.subr.bf16.mxu0 %v839_v38 }
  0x74   :  { %863 = vmatpush3.bf16.msra.mxu1 %v862_v29 }
  0x75   :  { %864 = vmatprep.subr.bf16.mxu1 %v975_v23 }
  0x76   :  { %842 = vmatpush3.bf16.msra.mxu0 %v841_v46 }
  0x78   :  { %866 = vmatpush3.bf16.msra.mxu1 %v865_v48 }
  0x79   :  { %497 = vmatmul.mubr.f32.vlgmr.msra.gmra.mrb[2].mxu0 %v170_v49 }
  0x7b   :  { %745 = vmatmul.mubr.f32.vlgmr.msra.gmra.mrb[2].mxu1 %v172_v50 }
 0x12c   :  { %v622_v51 = vpop.f32.mrb[0].mxu0 }
 0x12d   :  { %v623_v53 = vpop.f32.mrb[1].mxu0 }
 0x12e   :  { %v624_v54 = vadd.f32 %v623_v53, %v622_v51  ;;  %v657_v55 = vpop.f32.mrb[0].mxu1 }
 0x12f   :  { %v658_v56 = vpop.f32.mrb[1].mxu1 }
 0x130   :  { %v359_v57 = vadd.f32 %v624_v54, %v589_v52  ;;  %v659_v58 = vadd.f32 %v658_v56, %v657_v55 }
 0x132   :  { %v429_v59 = vadd.f32 %v659_v58, %v359_v57 }
 0x14c   :  { %v692_v60 = vpop.f32.mrb[2].mxu0 }
 0x14d   :  { %v693_v62 = vpop.f32.mrb[3].mxu0 }
 0x14e   :  { %v694_v23 = vadd.f32 %v693_v62, %v692_v60  ;;  %v568_v63 = vpop.f32.mrb[2].mxu1 }
 0x14f   :  { %v746_v0 = vpop.f32.mrb[3].mxu1 }
 0x150   :  { %v499_v1 = vadd.f32 %v694_v23, %v429_v59 }
 0x152   :  { %v569_v2 = vadd.f32 %v568_v63, %v499_v1 }
 0x154   :  { %572 = vst [vmem:[#allocation8] sm:$0xff] %v569_v2 }
 0x155   :  { %953 = shalt.err (!%p950_p0)
}
 0x156   :  { %s954_s30 = scalar_lea.hbm %s1116_s4, 128 }
 0x157   :  { %p955_p1 = scmp.ne.s32.totalorder %s1116_s4, %s954_s30  ;;  %p958_p2 = scmp.lt.u32.totalorder %s954_s30, %s1116_s4 }
 0x159   :  { %p960_p3 = pnand %p958_p2, %p955_p1 }
 0x15b   :  { %963 = shalt.err (!%p960_p3)
}
 0x15c   :  { %582 = dma.vmem_to_hbm [thread:$0]  %s580_s27, 128, %s1116_s4, [#allocation4]  }
 0x15d   :  { %968 = dma.done.wait [#allocation4], 128  }
 0x15e   :  { %969 = vsyncadd [#allocation4], 4294967168 }
 0x15f   :  { %586 = vsyncpa [#allocation3], 1 }
 0x160   :  { %587 = vsyncpa [#allocation6], 1 }
 0x161   :  { %588 = vsyncpa [#allocation4], 1 }

</bundles_post_ra>
